<compile_context>
chip_gen: v7x
topology: tpu7x:2x2x1
jax: 0.10.0
libtpu: 0.0.40
codegen_flags: <defaults>
</compile_context>

<pallas_src>
import jax
import jax.numpy as jnp
from jax import lax
from jax.experimental import pallas as pl
from jax.experimental.pallas import tpu as pltpu

EPS = 1e-12  # F.normalize default eps


def _make_netvlad_kernel(use_bf16):
    """Kernel over one sample and one spatial tile.

    x_ref:    (C, T)   descriptors for this sample / spatial tile
    w_ref:    (K, C)   1x1 conv weight (vladv2=False -> no bias)
    cent_ref: (K, C)   cluster centroids (f32)
    out_ref:  (K, C)   fully-normalized VLAD block for this sample
    vlad_acc: (K, C)   f32 scratch accumulator (sum_t a[k,t] * xn[c,t])
    asum_acc: (K, 1)   f32 scratch accumulator (sum_t a[k,t])
    """
    mxu_dtype = jnp.bfloat16 if use_bf16 else jnp.float32

    def kernel(x_ref, w_ref, cent_ref, out_ref, vlad_acc, asum_acc):
        s = pl.program_id(1)

        @pl.when(s == 0)
        def _init():
            vlad_acc[...] = jnp.zeros_like(vlad_acc)
            asum_acc[...] = jnp.zeros_like(asum_acc)

        # --- descriptor-wise L2 normalization over channels (dim=1) ---------
        # Elementwise math in f32 (v5e has no bf16 VPU); rsqrt goes to the EUP.
        x = x_ref[...].astype(jnp.float32)                    # (C, T)
        ssq = jnp.sum(x * x, axis=0, keepdims=True)           # (1, T)
        xn = x * lax.rsqrt(jnp.maximum(ssq, EPS * EPS))       # (C, T)

        # --- 1x1 conv == channel contraction (MXU), softmax over clusters ---
        xn_mx = xn.astype(mxu_dtype)
        w = w_ref[...].astype(mxu_dtype)
        logits = jnp.dot(w, xn_mx,
                         preferred_element_type=jnp.float32)  # (K, T), T lane-dense
        m = jnp.max(logits, axis=0, keepdims=True)
        e = jnp.exp(logits - m)
        denom = jnp.sum(e, axis=0, keepdims=True)
        if use_bf16:
            a = e * pl.reciprocal(denom, approx=True)          # EUP slot, ~free
        else:
            a = e / denom                                      # exact (1e-5 check)

        # --- accumulate per-cluster aggregation over this spatial tile ------
        # vlad[k,c] += sum_t a[k,t] * xn[c,t]  (contract last dims, no .T / XLU)
        vlad_acc[...] += lax.dot_general(
            a.astype(mxu_dtype), xn_mx,
            dimension_numbers=(((1,), (1,)), ((), ())),
            preferred_element_type=jnp.float32)                # (K, C)
        asum_acc[...] += jnp.sum(a, axis=1, keepdims=True)     # (K, 1)

        # --- finalize: centroid subtraction + fused L2 normalizations -------
        @pl.when(s == pl.num_programs(1) - 1)
        def _finalize():
            vlad = vlad_acc[...] - cent_ref[...] * asum_acc[...]   # (K, C)
            issq = jnp.sum(vlad * vlad, axis=1, keepdims=True)     # (K, 1)
            r = lax.rsqrt(jnp.maximum(issq, EPS * EPS))            # intra scale
            # global norm of the intra-normalized rows, from issq (exact math):
            gssq = jnp.sum(issq * (r * r), keepdims=True)          # (1, 1)
            g = lax.rsqrt(jnp.maximum(gssq, EPS * EPS))            # global scale
            out_ref[...] = (vlad * (r * g)).astype(out_ref.dtype)  # one multiply

    return kernel


def _vmem_limit_bytes():
    """~3/4 of the device's physical (per-core) VMEM; conservative fallback."""
    try:
        cap = getattr(pltpu.get_tpu_info(), "vmem_capacity_bytes", None)
    except Exception:
        cap = None
    if not cap:
        cap = 64 * 1024 * 1024          # v7x per-core size (most restrictive)
    return int(cap) * 3 // 4            # v5e/v6e -> 96 MiB, v7x -> 48 MiB


def _pick_s_tile(S, C, K, x_itemsize, budget_bytes):
    """Largest spatial tile that divides S, is lane-legal, and fits the budget."""
    cands = sorted({S} | {t for t in range(128, S, 128) if S % t == 0},
                   reverse=True)

    def step_bytes(t):
        return (2 * C * t * x_itemsize          # double-buffered x tile
                + C * t * 4                     # xn (f32)
                + 4 * K * t * 4                 # logits / e / a temporaries
                + 4 * K * C * 4 + K * 4)        # w, cent, scratch, out block

    for t in cands:
        if step_bytes(t) <= budget_bytes:
            return t
    # TODO(synk): if even the smallest legal tile exceeds the budget (huge C),
    # also tile the channel axis with a two-level reduction.
    return cands[-1]


def netvlad_image_forward(x_nchw, conv_weight, centroids, *,
                          s_tile=None, compute_dtype=jnp.float32):
    """x_nchw: (N, C, H, W); conv_weight: (K, C); centroids: (K, C) -> (N, K*C)."""
    N, C, H, W = x_nchw.shape
    K = conv_weight.shape[0]
    S = H * W

    use_bf16 = jnp.dtype(compute_dtype) == jnp.dtype(jnp.bfloat16)
    x_dtype = jnp.bfloat16 if use_bf16 else jnp.float32

    # Natural layout: free reshape only, no HBM transpose.  (In production,
    # produce x in bf16 upstream so this cast never materializes either.)
    x = x_nchw.reshape(N, C, S).astype(x_dtype)
    w = conv_weight.astype(x_dtype)           # MXU operand dtype
    cent = centroids.astype(jnp.float32)      # elementwise math stays f32

    vmem_limit = _vmem_limit_bytes()
    if s_tile is None:
        s_tile = _pick_s_tile(S, C, K, jnp.dtype(x_dtype).itemsize,
                              vmem_limit // 2)
    if S % s_tile != 0 or not (s_tile == S or s_tile % 128 == 0):
        raise ValueError(f"s_tile={s_tile} must divide S={S} and be a "
                         f"multiple of 128 (or equal to S)")

    kernel = _make_netvlad_kernel(use_bf16)
    out = pl.pallas_call(
        kernel,
        out_shape=jax.ShapeDtypeStruct((N, K, C), jnp.float32),
        grid_spec=pltpu.PrefetchScalarGridSpec(
            num_scalar_prefetch=0,
            grid=(N, S // s_tile),                # (batch, spatial tiles)
            in_specs=[
                pl.BlockSpec((None, C, s_tile), lambda n, s: (n, 0, s)),
                pl.BlockSpec((K, C), lambda n, s: (0, 0)),   # resident weights
                pl.BlockSpec((K, C), lambda n, s: (0, 0)),   # resident centroids
            ],
            out_specs=pl.BlockSpec((None, K, C), lambda n, s: (n, 0, 0)),
            scratch_shapes=[
                pltpu.VMEM((K, C), jnp.float32),   # vlad accumulator
                pltpu.VMEM((K, 1), jnp.float32),   # soft-assignment mass
            ],
        ),
        compiler_params=pltpu.CompilerParams(
            dimension_semantics=("parallel", "arbitrary"),
            vmem_limit_bytes=vmem_limit,
        ),
    )(x, w, cent)

    # vlad.view(N, -1): free contiguous reshape in the wrapper.
    return out.reshape(N, K * C)


def _reference_forward(x_nchw, conv_weight, centroids):
    """Pure-JAX reference mirroring the PyTorch module (vladv2=False)."""
    N, C, H, W = x_nchw.shape
    K = conv_weight.shape[0]
    S = H * W
    x = x_nchw.astype(jnp.float32)
    cnorm = jnp.sqrt(jnp.sum(x * x, axis=1, keepdims=True))
    xn = x / jnp.maximum(cnorm, EPS)
    xf = xn.reshape(N, C, S)
    logits = jnp.einsum("kc,ncs->nks", conv_weight, xf)
    a = jax.nn.softmax(logits, axis=1)                     # (N, K, S)
    a_sum = jnp.sum(a, axis=2)                             # (N, K)
    vlad = jnp.einsum("nks,ncs->nkc", a, xf) - centroids[None] * a_sum[..., None]
    inorm = jnp.sqrt(jnp.sum(vlad * vlad, axis=2, keepdims=True))
    vlad = vlad / jnp.maximum(inorm, EPS)
    vlad = vlad.reshape(N, K * C)
    gnorm = jnp.sqrt(jnp.sum(vlad * vlad, axis=1, keepdims=True))
    return vlad / jnp.maximum(gnorm, EPS)


if __name__ == "__main__":
    # Small shapes consistent with the module's forward:
    #   N=16 samples, descriptor dim C=32, K=8 clusters, 16x16 spatial (S=256)
    #   -> exercises the S-tiling accumulator path with s_tile=128 (2 S steps).
    N, C, K, H, W = 16, 32, 8, 16, 16

    key = jax.random.PRNGKey(0)
    kx, kw, kc = jax.random.split(key, 3)
    x = jax.random.normal(kx, (N, C, H, W), dtype=jnp.float32)
    # Synthetic parameters (shapes from __init__):
    #   conv: Conv2d(dim, num_clusters, 1x1, bias=False) -> weight (K, C)
    #   centroids: (K, C), torch.rand-style uniform [0, 1)
    conv_weight = jax.random.normal(kw, (K, C), dtype=jnp.float32) * 0.1
    centroids = jax.random.uniform(kc, (K, C), dtype=jnp.float32)

    ref = _reference_forward(x, conv_weight, centroids)

    # Exact (f32) path, forced 2-way spatial tiling to exercise accumulation.
    out = jax.block_until_ready(
        netvlad_image_forward(x, conv_weight, centroids,
                              s_tile=128, compute_dtype=jnp.float32))
    assert out.shape == (N, K * C)
    assert jnp.allclose(out, ref, atol=1e-5, rtol=1e-5)

    # Production path: bf16 x in HBM + bf16 MXU operands, f32 accumulation.
    out_bf16 = jax.block_until_ready(
        netvlad_image_forward(x, conv_weight, centroids,
                              compute_dtype=jnp.bfloat16))
    assert out_bf16.shape == (N, K * C)
    assert jnp.allclose(out_bf16, ref, atol=2e-2, rtol=2e-2)

    print("KERNEL_OK")
</pallas_src>

<mosaic_0001>
module attributes {stable_mosaic.version = 11 : i64} {
  func.func @kernel(%arg0: i32, %arg1: i32, %arg2: memref<1x32x128xf32, #tpu.memory_space<vmem>>, %arg3: memref<8x32xf32, #tpu.memory_space<vmem>>, %arg4: memref<8x32xf32, #tpu.memory_space<vmem>>, %arg5: memref<1x8x32xf32, #tpu.memory_space<vmem>>, %arg6: memref<8x32xf32, #tpu.memory_space<vmem>>, %arg7: memref<8x1xf32, #tpu.memory_space<vmem>>) attributes {dimension_semantics = [#tpu.dimension_semantics<parallel>, #tpu.dimension_semantics<arbitrary>], iteration_bounds = array<i64: 16, 2>, scalar_prefetch = 0 : i64, scratch_operands = 2 : i64, tpu.core_type = #tpu.core_type<tc>, window_params = [{transform_indices = @transform_0, window_bounds = array<i64: 1, 32, 128>}, {pipeline_mode = #tpu.pipeline_mode<synchronous>, transform_indices = @transform_1, window_bounds = array<i64: 8, 32>}, {pipeline_mode = #tpu.pipeline_mode<synchronous>, transform_indices = @transform_2, window_bounds = array<i64: 8, 32>}, {transform_indices = @transform_3, window_bounds = array<i64: 1, 8, 32>}]} {
    %c0_i32 = arith.constant 0 : i32
    %0 = arith.cmpi eq, %arg1, %c0_i32 : i32
    %1 = arith.extui %0 : i1 to i32
    %c0_i32_0 = arith.constant 0 : i32
    %2 = arith.cmpi ne, %1, %c0_i32_0 : i32
    scf.if %2 {
      %cst_20 = arith.constant 0.000000e+00 : f32
      %36 = vector.broadcast %cst_20 : f32 to vector<8x32xf32>
      %c0_21 = arith.constant 0 : index
      %c0_22 = arith.constant 0 : index
      %37 = vector.load %arg6[%c0_21, %c0_22] : memref<8x32xf32, #tpu.memory_space<vmem>>, vector<8x32xf32>
      tpu.vector_store %arg6[%c0_21, %c0_22], %36 {strides = array<i32>} : memref<8x32xf32, #tpu.memory_space<vmem>>, vector<8x32xf32>,
      %cst_23 = arith.constant 0.000000e+00 : f32
      %38 = vector.broadcast %cst_23 : f32 to vector<8x1xf32>
      %c0_24 = arith.constant 0 : index
      %c0_25 = arith.constant 0 : index
      %39 = vector.load %arg7[%c0_24, %c0_25] : memref<8x1xf32, #tpu.memory_space<vmem>>, vector<8x1xf32>
      tpu.vector_store %arg7[%c0_24, %c0_25], %38 {strides = array<i32>} : memref<8x1xf32, #tpu.memory_space<vmem>>, vector<8x1xf32>,
    } else {
    }
    %c0 = arith.constant 0 : index
    %c0_1 = arith.constant 0 : index
    %c0_2 = arith.constant 0 : index
    %3 = vector.load %arg2[%c0, %c0_1, %c0_2] : memref<1x32x128xf32, #tpu.memory_space<vmem>>, vector<1x32x128xf32>
    %4 = vector.shape_cast %3 : vector<1x32x128xf32> to vector<32x128xf32>
    %5 = arith.mulf %4, %4 : vector<32x128xf32>
    %cst = arith.constant dense<0.000000e+00> : vector<128xf32>
    %6 = vector.multi_reduction <add>, %5, %cst [0] : vector<32x128xf32> to vector<128xf32>
    %7 = vector.shape_cast %6 : vector<128xf32> to vector<1x128xf32>
    %cst_3 = arith.constant 1.000000e-24 : f32
    %8 = vector.broadcast %cst_3 : f32 to vector<1x128xf32>
    %9 = arith.maximumf %7, %8 : vector<1x128xf32>
    %10 = math.rsqrt %9 : vector<1x128xf32>
    %11 = vector.broadcast %10 : vector<1x128xf32> to vector<32x128xf32>
    %12 = arith.mulf %4, %11 : vector<32x128xf32>
    %c0_4 = arith.constant 0 : index
    %c0_5 = arith.constant 0 : index
    %13 = vector.load %arg3[%c0_4, %c0_5] : memref<8x32xf32, #tpu.memory_space<vmem>>, vector<8x32xf32>
    %cst_6 = arith.constant dense<0.000000e+00> : vector<8x128xf32>
    %14 = tpu.matmul %13, %12, %cst_6 {dimension_numbers = #tpu.dot_dimension_numbers<[1], [0], [0], [1], [0, 0, 1, 1], [], []>} : vector<8x32xf32>, vector<32x128xf32>, vector<8x128xf32> -> vector<8x128xf32>
    %cst_7 = arith.constant dense<0xFF800000> : vector<128xf32>
    %15 = vector.multi_reduction <maximumf>, %14, %cst_7 [0] : vector<8x128xf32> to vector<128xf32>
    %16 = vector.shape_cast %15 : vector<128xf32> to vector<1x128xf32>
    %17 = vector.broadcast %16 : vector<1x128xf32> to vector<8x128xf32>
    %18 = arith.subf %14, %17 : vector<8x128xf32>
    %19 = math.exp %18 : vector<8x128xf32>
    %cst_8 = arith.constant dense<0.000000e+00> : vector<128xf32>
    %20 = vector.multi_reduction <add>, %19, %cst_8 [0] : vector<8x128xf32> to vector<128xf32>
    %21 = vector.shape_cast %20 : vector<128xf32> to vector<1x128xf32>
    %22 = vector.broadcast %21 : vector<1x128xf32> to vector<8x128xf32>
    %23 = arith.divf %19, %22 : vector<8x128xf32>
    %c0_9 = arith.constant 0 : index
    %c0_10 = arith.constant 0 : index
    %24 = vector.load %arg6[%c0_9, %c0_10] : memref<8x32xf32, #tpu.memory_space<vmem>>, vector<8x32xf32>
    %cst_11 = arith.constant dense<0.000000e+00> : vector<8x32xf32>
    %25 = tpu.matmul %23, %12, %cst_11 {dimension_numbers = #tpu.dot_dimension_numbers<[1], [1], [0], [0], [0, 0, 1, 0], [], []>} : vector<8x128xf32>, vector<32x128xf32>, vector<8x32xf32> -> vector<8x32xf32>
    %26 = arith.addf %24, %25 : vector<8x32xf32>
    %c0_12 = arith.constant 0 : index
    %c0_13 = arith.constant 0 : index
    %27 = vector.load %arg6[%c0_12, %c0_13] : memref<8x32xf32, #tpu.memory_space<vmem>>, vector<8x32xf32>
    tpu.vector_store %arg6[%c0_12, %c0_13], %26 {strides = array<i32>} : memref<8x32xf32, #tpu.memory_space<vmem>>, vector<8x32xf32>,
    %c0_14 = arith.constant 0 : index
    %c0_15 = arith.constant 0 : index
    %28 = vector.load %arg7[%c0_14, %c0_15] : memref<8x1xf32, #tpu.memory_space<vmem>>, vector<8x1xf32>
    %cst_16 = arith.constant dense<0.000000e+00> : vector<8xf32>
    %29 = vector.multi_reduction <add>, %23, %cst_16 [1] : vector<8x128xf32> to vector<8xf32>
    %30 = vector.shape_cast %29 : vector<8xf32> to vector<8x1xf32>
    %31 = arith.addf %28, %30 : vector<8x1xf32>
    %c0_17 = arith.constant 0 : index
    %c0_18 = arith.constant 0 : index
    %32 = vector.load %arg7[%c0_17, %c0_18] : memref<8x1xf32, #tpu.memory_space<vmem>>, vector<8x1xf32>
    tpu.vector_store %arg7[%c0_17, %c0_18], %31 {strides = array<i32>} : memref<8x1xf32, #tpu.memory_space<vmem>>, vector<8x1xf32>,
    %c1_i32 = arith.constant 1 : i32
    %33 = arith.cmpi eq, %arg1, %c1_i32 : i32
    %34 = arith.extui %33 : i1 to i32
    %c0_i32_19 = arith.constant 0 : i32
    %35 = arith.cmpi ne, %34, %c0_i32_19 : i32
    scf.if %35 {
      %c0_20 = arith.constant 0 : index
      %c0_21 = arith.constant 0 : index
      %36 = vector.load %arg6[%c0_20, %c0_21] : memref<8x32xf32, #tpu.memory_space<vmem>>, vector<8x32xf32>
      %c0_22 = arith.constant 0 : index
      %c0_23 = arith.constant 0 : index
      %37 = vector.load %arg4[%c0_22, %c0_23] : memref<8x32xf32, #tpu.memory_space<vmem>>, vector<8x32xf32>
      %c0_24 = arith.constant 0 : index
      %c0_25 = arith.constant 0 : index
      %38 = vector.load %arg7[%c0_24, %c0_25] : memref<8x1xf32, #tpu.memory_space<vmem>>, vector<8x1xf32>
      %39 = vector.broadcast %38 : vector<8x1xf32> to vector<8x32xf32>
      %40 = arith.mulf %37, %39 : vector<8x32xf32>
      %41 = arith.subf %36, %40 : vector<8x32xf32>
      %42 = arith.mulf %41, %41 : vector<8x32xf32>
      %cst_26 = arith.constant dense<0.000000e+00> : vector<8xf32>
      %43 = vector.multi_reduction <add>, %42, %cst_26 [1] : vector<8x32xf32> to vector<8xf32>
      %44 = vector.shape_cast %43 : vector<8xf32> to vector<8x1xf32>
      %cst_27 = arith.constant 1.000000e-24 : f32
      %45 = vector.broadcast %cst_27 : f32 to vector<8x1xf32>
      %46 = arith.maximumf %44, %45 : vector<8x1xf32>
      %47 = math.rsqrt %46 : vector<8x1xf32>
      %48 = arith.mulf %47, %47 : vector<8x1xf32>
      %49 = arith.mulf %44, %48 : vector<8x1xf32>
      %50 = vector.shape_cast %49 : vector<8x1xf32> to vector<1x8x1xf32>
      %cst_28 = arith.constant dense<0.000000e+00> : vector<1xf32>
      %51 = vector.multi_reduction <add>, %50, %cst_28 [1, 2] : vector<1x8x1xf32> to vector<1xf32>
      %52 = vector.shape_cast %51 : vector<1xf32> to vector<1x1x1xf32>
      %53 = vector.extract %52[0, 0, 0] : f32 from vector<1x1x1xf32>
      %54 = vector.broadcast %53 : f32 to vector<1x1xf32>
      %cst_29 = arith.constant 1.000000e-24 : f32
      %55 = vector.broadcast %cst_29 : f32 to vector<1x1xf32>
      %56 = arith.maximumf %54, %55 : vector<1x1xf32>
      %57 = math.rsqrt %56 : vector<1x1xf32>
      %58 = vector.broadcast %57 : vector<1x1xf32> to vector<8x1xf32>
      %59 = arith.mulf %47, %58 : vector<8x1xf32>
      %60 = vector.broadcast %59 : vector<8x1xf32> to vector<8x32xf32>
      %61 = arith.mulf %41, %60 : vector<8x32xf32>
      %c0_30 = arith.constant 0 : index
      %c0_31 = arith.constant 0 : index
      %c0_32 = arith.constant 0 : index
      %62 = vector.load %arg5[%c0_30, %c0_31, %c0_32] : memref<1x8x32xf32, #tpu.memory_space<vmem>>, vector<1x8x32xf32>
      %63 = vector.shape_cast %62 : vector<1x8x32xf32> to vector<8x32xf32>
      %64 = vector.shape_cast %61 : vector<8x32xf32> to vector<1x8x32xf32>
      tpu.vector_store %arg5[%c0_30, %c0_31, %c0_32], %64 {strides = array<i32>} : memref<1x8x32xf32, #tpu.memory_space<vmem>>, vector<1x8x32xf32>,
    } else {
    }
    return
  }
  func.func @transform_0(%arg0: i32, %arg1: i32) -> (i32, i32, i32) {
    %c0_i32 = arith.constant 0 : i32
    %c0_i32_0 = arith.constant 0 : i32
    return %arg0, %c0_i32, %arg1 : i32, i32, i32
  }
  func.func @transform_1(%arg0: i32, %arg1: i32) -> (i32, i32) {
    %c0_i32 = arith.constant 0 : i32
    %c0_i32_0 = arith.constant 0 : i32
    %c0_i32_1 = arith.constant 0 : i32
    return %c0_i32, %c0_i32_0 : i32, i32
  }
  func.func @transform_2(%arg0: i32, %arg1: i32) -> (i32, i32) {
    %c0_i32 = arith.constant 0 : i32
    %c0_i32_0 = arith.constant 0 : i32
    %c0_i32_1 = arith.constant 0 : i32
    return %c0_i32, %c0_i32_0 : i32, i32
  }
  func.func @transform_3(%arg0: i32, %arg1: i32) -> (i32, i32, i32) {
    %c0_i32 = arith.constant 0 : i32
    %c0_i32_0 = arith.constant 0 : i32
    %c0_i32_1 = arith.constant 0 : i32
    return %arg0, %c0_i32, %c0_i32_0 : i32, i32, i32
  }
}

</mosaic_0001>

<bundles_post_ra>
// kernel: tpu_custom_call.1
= control target key start
LH: loop header
LB: loop body
LE: loop exit
PB: predicated region body
PF: predicated region fallthrough
CT: control target
= control target key end

     0   :  { %s1340_s0 = inlined_call_operand.hbm [shape: f32[16,32,256], index: 0, kind: input, shape index: {}]   ;;  %s1341_s1 = inlined_call_operand.hbm [shape: f32[8,32], index: 1, kind: input, shape index: {}]   ;;  %s1342_s2 = inlined_call_operand.hbm [shape: f32[8,32], index: 2, kind: input, shape index: {}]   ;;  %s1343_s3 = inlined_call_operand.hbm [shape: f32[16,8,32], index: 3, kind: output, shape index: {}]  }
   0x1   :  { %1352 = sst [smem:[#allocation16_spill]] %s1341_s1 }
   0x2   :  { %1353 = sst [smem:[#allocation17_spill]] %s1342_s2 }
   0x3   :  { %8 = vsyncpa [#allocation5], 0 }
   0x4   :  { %10 = vsyncpa [#allocation5 + $0x1], 0 }
   0x5   :  { %11 = vsyncpa [#allocation8], 0 }
   0x6   :  { %12 = vsyncpa [#allocation6], 0 }
   0x7   :  { %14 = vsyncpa [#allocation6 + $0x1], 0  ;;  %s1040_s12 = smov 0   ;;  %s1042_s13 = smov 0  }
   0x8   :  { %s1044_s14 = smov 0   ;;  %s1046_s15 = smov 0  }
   0x9   :  { %s1048_s16 = smov 0   ;;  %s1050_s17 = smov 0  }
   0xa   :  { %s1052_s18 = smov 0   ;;  %s1054_s19 = smov 0  }
   0xb   :  { %s1056_s20 = smov 0   ;;  %s1058_s21 = smov 0  }
   0xc   :  { %s1060_s22 = smov 0  }
   0xd LB: > { %s585_s23 = sadd.s32 4294967295, %s1006_s22   ;;  %s586_s24 = sadd.s32 4294967294, %s1006_s22   ;;  %s1006_s22 = sphi %s1060_s22, %s20_s22   ;;  %s1002_s21 = sphi %s1058_s21, %s1385_s21   ;;  %s998_s20 = sphi %s1056_s20, %s1384_s20   ;;  %s994_s19 = sphi %s1054_s19, %s1383_s19   ;;  %s990_s18 = sphi %s1052_s18, %s1382_s18   ;;  %s986_s17 = sphi %s1050_s17, %s1381_s17   ;;  %s982_s16 = sphi %s1048_s16, %s1380_s16   ;;  %s978_s15 = sphi %s1046_s15, %s1379_s15   ;;  %s974_s14 = sphi %s1044_s14, %s1378_s14   ;;  %s970_s13 = sphi %s1042_s13, %s1377_s13   ;;  %s966_s12 = sphi %s1040_s12, %s1376_s12  }
   0xe   : > { %p48_p0 = scmp.ne.s32.totalorder %s986_s17, %s982_s16  ;;  %p49_p1 = scmp.eq.s32.totalorder %s1006_s22, 0 }
   0xf   : > { %p54_p2 = scmp.ne.s32.totalorder %s982_s16, %s978_s15  ;;  %p1100_p3 = scmp.eq.s32.totalorder %s585_s23, 0 }
  0x10   : > { %p1105_p4 = por %p49_p1, %p48_p0  ;;  %p119_p5 = scmp.ne.s32.totalorder %s974_s14, %s970_s13 }
  0x11   : > { %s1354_s26 = scalar_select %p1100_p3, 1, 0 }
  0x12   : > { %p1113_p6 = por %p1100_p3, %p54_p2  ;;  %p120_p7 = scmp.eq.s32.totalorder %s585_s23, 31 }
  0x13   : > { %p125_p8 = scmp.ne.s32.totalorder %s970_s13, %s966_s12  ;;  %p126_p9 = scmp.eq.s32.totalorder %s586_s24, 31 }
  0x14   : > { %s1356_s29 = scalar_select %p1113_p6, 1, 0 }
  0x15   : > { %p1119_p10 = por %p120_p7, %p119_p5  ;;  %p587_p11 = scmp.ge.s32.totalorder %s1006_s22, 1 }
  0x16   : > { %p1124_p12 = por %p126_p9, %p125_p8  ;;  %p133_p13 = scmp.lt.s32.totalorder %s1006_s22, 33 }
  0x17   : > { %s1357_s30 = scalar_select %p1119_p10, 1, 0 }
  0x18   : > { %s1358_s4 = scalar_select %p1124_p12, 1, 0 }
  0x19   : > { %p1129_p0 = pnand %p587_p11, %p133_p13  ;;  %s1008_s6 = smov [#allocation7]  }
  0x1a   : > { %1359 = sst [smem:[#allocation14_spill]] %s1358_s4  ;;  %s146_s7 = sshll.u32 %s1008_s6, 4  ;;  %s147_s7 = int_to_ptr.vmem [resolvable:$true] %s146_s7 }
  0x1b   : > { %s1360_s5 = scalar_select %p1129_p0, 1, 0 }
  0x1c   : > { %p664_p1 = pneg %p1129_p0  ;;  %p681_p2 = scmp.lt.s32.totalorder %s1006_s22, 32 }
  0x1d   : > { %s1009_s10 = smov [#allocation9]   ;;  %s1363_s1 = sld [smem:[#allocation16_spill]] }
  0x1e   : > { %p1138_p5 = pnand %p664_p1, %p1100_p3  ;;  %p1144_p7 = pnand %p681_p2, %p1105_p4 }
  0x1f   : > { %s157_s11 = sshll.u32 %s1009_s10, 4  ;;  %s158_s11 = int_to_ptr.vmem [resolvable:$true] %s157_s11 }
  0x20   : > { %s1362_s9 = scalar_select %p1144_p7, 1, 0 }
  0x21   : > { %p796_p9 = pneg %p1138_p5 }
  0x23   : > { %s794_s24 = scalar_lea.hbm %s1363_s1, 128 }
  0x24   : > { %p795_p8 = scmp.ne.s32.totalorder %s1363_s1, %s794_s24  ;;  %p801_p4 = scmp.lt.u32.totalorder %s794_s24, %s1363_s1 }
  0x26   : > { %p797_p11 = pnand %p796_p9, %p795_p8 }
  0x28   : > { %p798_p13 = pneg %p797_p11 }
  0x2a   : > { %p803_p1 = pnand %p801_p4, %p798_p13 }
  0x2c   : > { %806 = shalt.err (!%p803_p1)
}
  0x2d   : > { %s807_s10 = scalar_lea.vmem %s147_s7, 128  ;;  %p815_p3 = scmp.lt.s32.totalorder %s147_s7, %s147_s7 }
  0x2e   : > { %p808_p2 = scmp.ne.s32.totalorder %s147_s7, %s807_s10  ;;  %p816_p6 = scmp.lt.s32.totalorder %s807_s10, %s807_s10 }
  0x30   : > { %p810_p12 = pnand %p808_p2, %p796_p9  ;;  %p817_p0 = por %p816_p6, %p815_p3 }
  0x32   : > { %p811_p10 = pneg %p810_p12 }
  0x34   : > { %p818_p7 = pnand %p817_p0, %p811_p10 }
  0x36   : > { %821 = shalt.err (!%p818_p7)
}
  0x37   : > { %667 = dma.hbm_to_vmem [thread:$0]  (!%p1138_p5), %s1363_s1, 128, %s147_s7, [#allocation8]  }
  0x38   : > { %s1364_s2 = sld [smem:[#allocation17_spill]] }
  0x3e   : > { %s822_s24 = scalar_lea.hbm %s1364_s2, 128 }
  0x3f   : > { %p823_p12 = scmp.ne.s32.totalorder %s1364_s2, %s822_s24  ;;  %p829_p10 = scmp.lt.u32.totalorder %s822_s24, %s1364_s2 }
  0x41   : > { %p825_p3 = pnand %p823_p12, %p796_p9 }
  0x43   : > { %p826_p6 = pneg %p825_p3 }
  0x45   : > { %p831_p0 = pnand %p829_p10, %p826_p6 }
  0x47   : > { %834 = shalt.err (!%p831_p0)
}
  0x48   : > { %s835_s7 = scalar_lea.vmem %s158_s11, 128  ;;  %p843_p13 = scmp.lt.s32.totalorder %s158_s11, %s158_s11 }
  0x49   : > { %p836_p7 = scmp.ne.s32.totalorder %s158_s11, %s835_s7  ;;  %p844_p4 = scmp.lt.s32.totalorder %s835_s7, %s835_s7 }
  0x4b   : > { %p838_p8 = pnand %p836_p7, %p796_p9  ;;  %p845_p1 = por %p844_p4, %p843_p13 }
  0x4d   : > { %p839_p11 = pneg %p838_p8 }
  0x4f   : > { %p846_p2 = pnand %p845_p1, %p839_p11 }
  0x51   : > { %849 = shalt.err (!%p846_p2)
}
  0x52   : > { %670 = dma.hbm_to_vmem [thread:$0]  (!%p1138_p5), %s1364_s2, 128, %s158_s11, [#allocation8]  }
  0x53   : > { %s32_s4 = sadd.s32 1, %s1002_s21  ;;  %s29_s27 = sadd.s32 1, %s998_s20 }
  0x54   : > { %s168_s23 = sand.u32 1, %s986_s17   ;;  %p30_p9 = scmp.ge.s32.totalorder %s29_s27, 2 }
  0x55   : > { %s591_s24 = sshll.u32 %s168_s23, 5  ;;  %s592_s6 = sshll.u32 %s1002_s21, 3 }
  0x56   : > { %s1387_s27 = smov (%p30_p9, %s29_s27), 0  ;;  %s1389_s4 = smov (!%p30_p9, %s32_s4), %s1002_s21 }
  0x57   : > { %1365 = sst [smem:[#allocation15_spill]] %s1387_s27  ;;  %s37_s8 = ssub.s32 %s998_s20, %s1387_s27 }
  0x58   : > { %p34_p12 = scmp.ge.s32.totalorder %s1389_s4, 16  ;;  %s177_s28 = sadd.s32 %s998_s20, %s592_s6 }
  0x59   : > { %s593_s11 = sshll.u32 %s177_s28, 7  ;;  %s172_s10 = scalar_lea.vmem [#allocation4], %s591_s24 }
  0x5a   : > { %s180_s7 = sshll.u32 %s172_s10, 4  ;;  %s1391_s4 = smov (%p34_p12, %s1389_s4), 0  ;;  %s1207_s7 = int_to_ptr.vmem [resolvable:$true] %s180_s7 }
  0x5b   : > { %s1205_s1 = scalar_lea.hbm %s1340_s0, %s593_s11  ;;  %s36_s2 = ssub.s32 %s1002_s21, %s1391_s4 }
  0x5c   : > { %s38_s6 = sor.u32 %s37_s8, %s36_s2  ;;  %p107_p5 = scmp.eq.s32.totalorder %s36_s2, 0 }
  0x5d   : > { %p39_p3 = scmp.eq.s32.totalorder %s38_s6, 0  ;;  %s1366_s24 = sadd.s32 1, %s974_s14 }
  0x5e   : > { %s1214_s28 = scalar_select %p107_p5, %s974_s14, %s1366_s24  }
  0x5f   : > { %s1367_s10 = sadd.s32 1, %s986_s17  ;;  %s1221_s25 = scalar_lea.sflag [#allocation5], %s168_s23 }
  0x60   : > { %s1219_s27 = scalar_select %p39_p3, %s986_s17, %s1367_s10  }
  0x61   : > { %s850_s11 = scalar_lea.hbm %s1205_s1, 512  ;;  %p1368_p10 = scmp.ne.s32.totalorder %s1362_s9, 0 }
  0x62   : > { %p851_p6 = scmp.ne.s32.totalorder %s1205_s1, %s850_s11  ;;  %s855_s2 = scalar_lea.hbm %s1340_s0, 16384 }
  0x63   : > { %p852_p0 = pneg %p1368_p10  ;;  %p856_p11 = scmp.lt.u32.totalorder %s1205_s1, %s1340_s0 }
  0x64   : > { %p857_p13 = scmp.lt.u32.totalorder %s855_s2, %s850_s11  ;;  %p859_p1 = scmp.lt.u32.totalorder %s850_s11, %s1205_s1 }
  0x65   : > { %p853_p7 = pnand %p852_p0, %p851_p6 }
  0x66   : > { %p858_p4 = por %p857_p13, %p856_p11 }
  0x67   : > { %p854_p8 = pneg %p853_p7 }
  0x68   : > { %p860_p2 = por %p859_p1, %p858_p4 }
  0x6a   : > { %p861_p9 = pnand %p860_p2, %p854_p8 }
  0x6c   : > { %864 = shalt.err (!%p861_p9)
}
  0x6d   : > { %s865_s23 = scalar_lea.vmem %s1207_s7, 512  ;;  %s1010_s10 = smov [#allocation4]  }
  0x6e   : > { %p866_p12 = scmp.ne.s32.totalorder %s1207_s7, %s865_s23  ;;  %s870_s15 = sshll.u32 %s1010_s10, 4  ;;  %s871_s15 = int_to_ptr.vmem [resolvable:$false] %s870_s15 }
  0x6f   : > { %s872_s8 = scalar_lea.vmem %s871_s15, 1024  ;;  %p873_p6 = scmp.lt.s32.totalorder %s1207_s7, %s871_s15 }
  0x70   : > { %p868_p5 = pnand %p866_p12, %p852_p0  ;;  %p874_p7 = scmp.lt.s32.totalorder %s872_s8, %s865_s23 }
  0x72   : > { %p869_p3 = pneg %p868_p5  ;;  %p875_p11 = por %p874_p7, %p873_p6 }
  0x74   : > { %p876_p13 = pnand %p875_p11, %p869_p3 }
  0x76   : > { %879 = shalt.err (!%p876_p13)
}
  0x77   : > { %s1011_s11 = smov 256   ;;  %s1012_s2 = smov 128  }
  0x78   : > { %s1013_s6 = smov 8   ;;  %p1369_p0 = scmp.ne.s32.totalorder %s1360_s5, 0 }
  0x79   : > { %674 = dma.hbm_to_vmem [thread:$0]  (!%p1368_p10), %s1205_s1, 512, %s1207_s7, %s1221_s25, %s1011_s11, %s1012_s2, %s1013_s6  }
  0x7a   : > { %192 = sbr.rel (%p1369_p0) target bundleno = 1146 (0x47a), region = 32  ;;  %s194_s24 = sand.u32 (!%p1369_p0), 1, %s982_s16  }
  0x7b   : > { %s595_s10 = sshll.u32 (!%p1369_p0), %s194_s24, 5  ;;  %s195_s23 = scalar_lea.sflag (!%p1369_p0), [#allocation5], %s194_s24 }
  0x7c   : > { %s198_s15 = scalar_lea.vmem (!%p1369_p0), [#allocation4], %s595_s10  ;;  %p1370_p8 = scmp.ne.s32.totalorder (!%p1369_p0), %s1356_s29, 0 }
  0x81   : > { %953 = dma.done.wait (%p1370_p8), %s195_s23, 512  }
  0x82   : > { %955 = vsyncadd (%p1370_p8), %s195_s23, 4294966784  ;;  %p1371_p4 = scmp.ne.s32.totalorder %s1354_s26, 0 }
  0x84   : > { %957 = dma.done.wait (%p1371_p4), [#allocation8], 256  }
  0x85   : > { %959 = vsyncadd (%p1371_p4), [#allocation8], 4294967040  ;;  %s226_s1 = sand.u32 1, %s970_s13   ;;  %p599_p10 = scmp.ne.s32.totalorder %s990_s18, 0 }
  0x86   : > { %s1263_s5 = sshll.u32 %s226_s1, 3  ;;  %vm233_vm0 = vcmask (!%p599_p10), 261120   ;;  %vm235_vm1 = vcmask (!%p599_p10), 7168   ;;  %v1014_v0 = vmov (!%p599_p10), 0.0  }
  0x87   : > { %s228_s9 = scalar_lea.vmem [#allocation10], %s1263_s5  ;;  %232 = sbr.rel (%p599_p10) target bundleno = 142 (0x8e), region = 48  ;;  %234 = vst.msk [vmem:[#allocation2] sm:$0xff] (!%p599_p10), %vm233_vm0, %v1014_v0 }
  0x88   : > { %236 = vst.msk [vmem:[#allocation3] sm:$0xff] (!%p599_p10), %vm235_vm1, %v1014_v0 }
  0x8e PF: > { %v237_v1 = vld [vmem:[%s198_s15] sm:$0xff]  ;;  %v238_v2 = vld [vmem:[%s198_s15 + $0x8] sm:$0xff]  ;;  %v239_v3 = vld [vmem:[%s198_s15 + $0x10] sm:$0xff]  ;;  %v1015_v4 = vmov 0.0|0.0   ;;  %vm1016_vm2 = vmmov 0   ;;  %v1017_v9 = vmov 0.0  }
  0x8f   : > { %638 = vmatprep.subr.bf16.mxu0 %v1015_v4  ;;  %v240_v5 = vld [vmem:[%s198_s15 + $0x18] sm:$0xff]  ;;  %v241_v6 = vmul.f32 %v237_v1, %v237_v1  ;;  %v242_v7 = vmul.f32 %v238_v2, %v238_v2  ;;  %v243_v8 = vmul.f32 %v239_v3, %v239_v3  ;;  %624 = vmatprep.mubr.msk.f32.mxu0 %vm1016_vm2, %v1017_v9  ;;  %v260_v28 = vld [vmem:[#allocation7] sm:$0xff]  ;;  %vm261_vm3 = vcmask 261120   ;;  %v352_v51 = vld [vmem:[#allocation2] sm:$0xff]  ;;  %p601_p1 = scmp.ne.s32.totalorder %s990_s18, 1 }
  0x90   : > { %644 = vmatprep.subr.bf16.mxu1 %v1015_v4  ;;  %635 = vmatprep.mubr.msk.f32.mxu1 %vm1016_vm2, %v1017_v9  ;;  %v244_v10 = vmul.f32 %v240_v5, %v240_v5  ;;  %v425_v48 = vld [vmem:[#allocation3] sm:$0xff]  ;;  %vm429_vm4 = vcmask 7168   ;;  %v1018_v56 = vmov (!%p601_p1), 0   ;;  %v436_v57 = vld [vmem:[#allocation9] sm:$0xff] (!%p601_p1) }
  0x91   : > { %v245_v11 = vadd.f32 %v242_v7, %v241_v6  ;;  %789 = vset.pattern.permute.xlu0 (!%p601_p1), %v1018_v56 }
  0x93   : > { %v246_v12 = vadd.f32 %v245_v11, %v243_v8 }
  0x95   : > { %v247_v13 = vadd.f32 %v246_v12, %v244_v10 }
  0x97   : > { %v248_v14 = vrot.slane %v247_v13, 4 }
  0x99   : > { %v249_v15 = vadd.f32 %v248_v14, %v247_v13 }
  0x9b   : > { %v250_v16 = vrot.slane %v249_v15, 2 }
  0x9d   : > { %v251_v17 = vadd.f32 %v250_v16, %v249_v15 }
  0x9f   : > { %v252_v18 = vrot.slane %v251_v17, 1 }
  0xa1   : > { %v253_v19 = vadd.f32 %v252_v18, %v251_v17 }
  0xa3   : > { %v254_v20 = vmax.f32 %v253_v19, 1e-24 }
  0xa5   : > { %783 = vrsqrt.f32 %v254_v20 }
  0xaf   : > { %v784_v21 = vpop.eup %783 }
  0xb0   : > { %v256_v22 = vmul.f32 %v784_v21, %v237_v1  ;;  %v257_v23 = vmul.f32 %v784_v21, %v238_v2  ;;  %v258_v24 = vmul.f32 %v784_v21, %v239_v3  ;;  %v259_v25 = vmul.f32 %v784_v21, %v240_v5 }
  0xb2   : > { %v639_v26 = vpack.c.bf16 %v257_v23, %v256_v22  ;;  %v642_v27 = vpack.c.bf16 %v259_v25, %v258_v24 }
  0xb4   : > { %640 = vmatpush3.bf16.msra.mxu0 %v639_v26  ;;  %646 = vmatpush3.bf16.xpose.msra.mxu1 %v639_v26 }
  0xb5   : > { %641 = vmatprep.subr.bf16.mxu0 %v1015_v4  ;;  %647 = vmatprep.subr.bf16.mxu1 %v1015_v4 }
  0xb8   : > { %643 = vmatpush3.bf16.msra.mxu0 %v642_v27 }
  0xbb   : > { %625 = vmatmul.mubr.msk.f32.vlgmr.msra.gmra.mrb[0].mxu0 %vm261_vm3, %v260_v28 }
  0xbc   : > { %649 = vmatpush3.bf16.xpose.msra.mxu1 %v642_v27 }
 0x18e   : > { %v331_v29 = vpop.f32.mrb[0].mxu0 }
 0x18f   : > { %v335_v30 = vrot.slane %v331_v29, 4  ;;  %v626_v31 = vpop.f32.mrb[1].mxu0 }
 0x191   : > { %v336_v32 = vmax.f32 %v331_v29, %v335_v30 }
 0x193   : > { %v337_v33 = vrot.slane %v336_v32, 2 }
 0x195   : > { %v338_v34 = vmax.f32 %v336_v32, %v337_v33 }
 0x197   : > { %v339_v35 = vrot.slane %v338_v34, 1 }
 0x199   : > { %v340_v36 = vmax.f32 %v338_v34, %v339_v35 }
 0x19b   : > { %v341_v37 = vsub.f32 %v331_v29, %v340_v36 }
 0x19d   : > { %v342_v38 = vmul.f32 1.442695, %v341_v37 }
 0x19f   : > { %785 = vpow2.f32 %v342_v38 }
 0x1a9   : > { %v786_v39 = vpop.eup %785 }
 0x1aa   : > { %v344_v40 = vrot.slane %v786_v39, 4 }
 0x1ac   : > { %v345_v41 = vadd.f32 %v786_v39, %v344_v40 }
 0x1ae   : > { %v346_v42 = vrot.slane %v345_v41, 2 }
 0x1b0   : > { %v347_v43 = vadd.f32 %v346_v42, %v345_v41 }
 0x1b2   : > { %v348_v44 = vrot.slane %v347_v43, 1 }
 0x1b4   : > { %v349_v45 = vadd.f32 %v348_v44, %v347_v43 }
 0x1b6   : > { %787 = vrcp.f32 %v349_v45 }
 0x1c0   : > { %v788_v46 = vpop.eup %787 }
 0x1c1   : > { %v351_v47 = vmul.f32 %v788_v46, %v786_v39 }
 0x1c3   : > { %636 = vmatmul.mubr.f32.vlgmr.msra.gmra.mrb[0].mxu1 %v351_v47  ;;  %426 = vadd.xlane.f32.xlu0 %v351_v47 }
 0x250   : > { %v427_v49 = vpop.xlane.xlu0 %426 }
 0x251   : > { %v428_v50 = vadd.f32 %v427_v49, %v425_v48 }
 0x253   : > { %430 = vst.msk [vmem:[#allocation3] sm:$0xff] %vm429_vm4, %v428_v50 }
 0x25a   : > { %v437_v55 = vld [vmem:[#allocation3] sm:$0xff] (!%p601_p1) }
 0x25b   : > { %440 = vperm.xlu0 (!%p601_p1), %789, %v437_v55  }
 0x293   : > { %434 = sbr.rel (%p601_p1) target bundleno = 1121 (0x461), region = 52 }
 0x296   : > { %v419_v52 = vpop.f32.mrb[0].mxu1 }
 0x297   : > { %v423_v53 = vadd.f32 %v419_v52, %v352_v51  ;;  %v637_v54 = vpop.f32.mrb[1].mxu1 }
 0x299   : > { %424 = vst.msk [vmem:[#allocation2] sm:$0xff] %vm261_vm3, %v423_v53 }
 0x2a0   : > { %v435_v59 = vld [vmem:[#allocation2] sm:$0xff] }
 0x2da   : > { %v441_v58 = vpop.permute.xlu0 %440 }
 0x2db   : > { %v443_v60 = vmul.f32 %v441_v58, %v436_v57 }
 0x2dd   : > { %v444_v61 = vsub.f32 %v435_v59, %v443_v60 }
 0x2df   : > { %v445_v62 = vmul.f32 %v444_v61, %v444_v61 }
 0x2e1   : > { %v446_v63 = vsel %vm261_vm3, %v445_v62, 0.0 }
 0x2e2   : > { %447 = vadd.xlane.f32.xlu0 %v446_v63 }
 0x36f   : > { %v448_v0 = vpop.xlane.xlu0 %447 }
 0x370   : > { %v449_v1 = vmax.f32 %v448_v0, 1e-24 }
 0x372   : > { %790 = vrsqrt.f32 %v449_v1 }
 0x37c   : > { %v791_v2 = vpop.eup %790 }
 0x37d   : > { %v451_v3 = vmul.f32 %v791_v2, %v791_v2 }
 0x37f   : > { %v452_v4 = vmul.f32 %v451_v3, %v448_v0 }
 0x381   : > { %v453_v5 = vsel %vm429_vm4, %v452_v4, 0.0 }
 0x382   : > { %454 = vadd.xlane.f32.xlu1 %v453_v5 }
 0x40f   : > { %v455_v6 = vpop.xlane.xlu1 %454 }
 0x410   : > { %v456_v7 = vrot.slane %v455_v6, 4 }
 0x412   : > { %v457_v8 = vadd.f32 %v456_v7, %v455_v6 }
 0x414   : > { %v458_v9 = vrot.slane %v457_v8, 2 }
 0x416   : > { %v459_v10 = vadd.f32 %v458_v9, %v457_v8 }
 0x418   : > { %v460_v11 = vrot.slane %v459_v10, 1 }
 0x41a   : > { %v461_v12 = vadd.f32 %v460_v11, %v459_v10 }
 0x41c   : > { %650 = vpush %v461_v12 }
 0x44d   : > { %s651_s18 = spop %650 }
 0x44e   : > { %v463_v13 = vstv %s651_s18 }
 0x44f   : > { %v464_v14 = vmax.f32 %v463_v13, 1e-24 }
 0x451   : > { %792 = vrsqrt.f32 %v464_v14 }
 0x45b   : > { %v793_v15 = vpop.eup %792 }
 0x45c   : > { %v466_v16 = vmul.f32 %v793_v15, %v791_v2 }
 0x45e   : > { %v467_v17 = vmul.f32 %v466_v16, %v444_v61 }
 0x460   : > { %468 = vst.msk [vmem:[%s228_s9] sm:$0xff] %vm261_vm3, %v467_v17 }
 0x461 PF: > { %s603_s26 = sshll.u32 %s994_s19, 7  ;;  %s483_s8 = sshll.u32 %s228_s9, 4  ;;  %s484_s8 = int_to_ptr.vmem [resolvable:$true] %s483_s8 }
 0x462   : > { %s1280_s25 = scalar_lea.hbm %s1343_s3, %s603_s26  ;;  %s470_s11 = scalar_lea.sflag [#allocation6], %s226_s1 }
 0x463   : > { %s880_s2 = scalar_lea.vmem %s484_s8, 128  ;;  %p1372_p9 = scmp.ne.s32.totalorder %s1357_s30, 0 }
 0x464   : > { %p881_p2 = scmp.ne.s32.totalorder %s484_s8, %s880_s2  ;;  %s1019_s6 = smov [#allocation10]  }
 0x465   : > { %s884_s24 = sshll.u32 %s1019_s6, 4  ;;  %s885_s24 = int_to_ptr.vmem [resolvable:$false] %s884_s24 }
 0x466   : > { %p882_p12 = pnand %p881_p2, %p1372_p9  ;;  %s886_s10 = scalar_lea.vmem %s885_s24, 256 }
 0x467   : > { %p887_p3 = scmp.lt.s32.totalorder %s484_s8, %s885_s24  ;;  %p888_p6 = scmp.lt.s32.totalorder %s886_s10, %s880_s2 }
 0x468   : > { %p883_p5 = pneg %p882_p12 }
 0x469   : > { %p889_p7 = por %p888_p6, %p887_p3 }
 0x46b   : > { %p890_p11 = pnand %p889_p7, %p883_p5 }
 0x46d   : > { %893 = shalt.err (!%p890_p11)
}
 0x46e   : > { %s894_s19 = scalar_lea.hbm %s1280_s25, 128  ;;  %s898_s1 = scalar_lea.hbm %s1343_s3, 2048 }
 0x46f   : > { %p895_p13 = scmp.ne.s32.totalorder %s1280_s25, %s894_s19  ;;  %p899_p4 = scmp.lt.u32.totalorder %s1280_s25, %s1343_s3 }
 0x470   : > { %p900_p10 = scmp.lt.u32.totalorder %s898_s1, %s894_s19  ;;  %p902_p2 = scmp.lt.u32.totalorder %s894_s19, %s1280_s25 }
 0x471   : > { %p896_p0 = pnand %p895_p13, %p1372_p9 }
 0x472   : > { %p901_p1 = por %p900_p10, %p899_p4 }
 0x473   : > { %p897_p8 = pneg %p896_p0 }
 0x474   : > { %p903_p12 = por %p902_p2, %p901_p1 }
 0x476   : > { %p904_p5 = pnand %p903_p12, %p897_p8 }
 0x478   : > { %907 = shalt.err (!%p904_p5)
}
 0x479   : > { %662 = dma.vmem_to_hbm [thread:$0]  (%p1372_p9), %s484_s8, 128, %s1280_s25, %s470_s11  }
 0x47a PF: > { %s1373_s18 = sld [smem:[#allocation14_spill]]  ;;  %p684_p3 = scmp.ge.s32.totalorder %s1006_s22, 2 }
 0x47b   : > { %s495_s26 = sand.u32 1, %s966_s12  }
 0x47c   : > { %s496_s29 = scalar_lea.sflag [#allocation6], %s495_s26 }
 0x480   : > { %p1374_p6 = scmp.ne.s32.totalorder %s1373_s18, 0 }
 0x482   : > { %p676_p7 = pnand %p684_p3, %p1374_p6 }
 0x484   : > { %961 = dma.done.wait (!%p676_p7), %s496_s29, 128  }
 0x485   : > { %963 = vsyncadd (!%p676_p7), %s496_s29, 4294967168  ;;  %s20_s22 = sadd.s32 1, %s1006_s22   ;;  %s1375_s30 = sld [smem:[#allocation15_spill]] }
 0x486   : > { %p17_p11 = scmp.ge.s32.totalorder %s20_s22, 34   ;;  %s1376_s12 = smov %s970_s13 }
 0x487   : > { %s1377_s13 = smov %s974_s14  ;;  %s1378_s14 = smov %s1214_s28 }
 0x488   : > { %s1379_s15 = smov %s982_s16  ;;  %s1380_s16 = smov %s986_s17 }
 0x489   : > { %s1381_s17 = smov %s1219_s27  ;;  %s1382_s18 = smov %s998_s20 }
 0x48a   : > { %s1383_s19 = smov %s1002_s21  ;;  %s1385_s21 = smov %s1391_s4 }
 0x48b   : > { %s1384_s20 = smov %s1375_s30  ;;  %19 = sbr.rel (!%p17_p11) target bundleno = 13 (0xd), region = 93 }
 0x492   :  { %501 = vsyncpa [#allocation5], 1 }
 0x493   :  { %503 = vsyncpa [#allocation5 + $0x1], 1 }
 0x494   :  { %504 = vsyncpa [#allocation8], 1 }
 0x495   :  { %505 = vsyncpa [#allocation6], 1 }
 0x496   :  { %507 = vsyncpa [#allocation6 + $0x1], 1 }

</bundles_post_ra>
